<compile_context>
chip_gen: v7x
topology: tpu7x:2x2x1
jax: 0.10.0
libtpu: 0.0.40
codegen_flags: <defaults>
</compile_context>

<pallas_src>
import math

import jax
import jax.numpy as jnp
from jax.experimental import pallas as pl
from jax.experimental.pallas import tpu as pltpu


# ----------------------------------------------------------------------------
# One-off probe: direction convention of pltpu.roll along the sublane axis.
# (Cached; guards the kernel against either rotate-direction convention.)
# ----------------------------------------------------------------------------
_ROLL_DOWN_IS_POSITIVE = None


def _roll_down_shift_is_positive():
    """True iff pltpu.roll(x, +1, axis=0) moves rows to HIGHER indices (np.roll)."""
    global _ROLL_DOWN_IS_POSITIVE
    if _ROLL_DOWN_IS_POSITIVE is None:
        def probe(x_ref, o_ref):
            o_ref[...] = pltpu.roll(x_ref[...], 1, 0)

        x = jnp.zeros((8, 128), jnp.float32).at[0, 0].set(1.0)
        y = pl.pallas_call(
            probe, out_shape=jax.ShapeDtypeStruct((8, 128), jnp.float32))(x)
        _ROLL_DOWN_IS_POSITIVE = bool(y[1, 0] == 1.0)
    return _ROLL_DOWN_IS_POSITIVE


# ----------------------------------------------------------------------------
# Kernel
# ----------------------------------------------------------------------------
def _make_kernel(H, roll_down_positive):
    def kernel(x_ref, w1_ref, b1_ref, w2_ref, b2_ref, o_ref):
        # x_ref : (M, L)   rows = (image-group, h), lanes = p_local*W*C + w*C + c
        # w*_ref: (3L, L)  kh-stacked, block-diagonal-over-p band matrices
        # b*_ref: (1, L)   bias tiled over (p, W)
        # o_ref : (M, L)
        x = x_ref[...]
        M, L = x.shape

        # Rolls are cyclic within the block; shifts are kept non-negative.
        dn_shift = 1 if roll_down_positive else M - 1       # row h gets row h-1
        up_shift = M - 1 if roll_down_positive else 1       # row h gets row h+1

        # h index of every row; zero the rolled-in rows at image boundaries
        # (implements the H zero-padding and blocks cross-image leakage).
        h = jax.lax.broadcasted_iota(jnp.int32, (M, L), 0) % H
        not_top = h != 0
        not_bot = h != H - 1

        def conv3x3(inp, w_ref):
            dn = jnp.where(not_top, pltpu.roll(inp, dn_shift, 0), 0.0)  # kh = 0
            up = jnp.where(not_bot, pltpu.roll(inp, up_shift, 0), 0.0)  # kh = 2
            lhs = jnp.concatenate([dn, inp, up], axis=1)                # (M, 3L)
            return jnp.dot(lhs, w_ref[...],
                           preferred_element_type=jnp.float32)          # (M, L)

        # conv1 + bias + ReLU (intermediate stays on-chip)
        mid = jnp.maximum(conv3x3(x, w1_ref) + b1_ref[...], 0.0)
        # conv2 + bias + skip, single lane-dense store
        o_ref[...] = (conv3x3(mid, w2_ref) + b2_ref[...] + x).astype(o_ref.dtype)

    return kernel


# ----------------------------------------------------------------------------
# Parameter preprocessing (pure JAX, outside the kernel)
# ----------------------------------------------------------------------------
def _band_matrices(w_hwio, W, p):
    """(3,3,Ci,Co) HWIO weights -> (3*p*W*Ci, p*W*Co) kh-stacked band matrix.

    Folds the kw taps + W zero-padding into the contraction dim; block-diagonal
    over the p lane-packed images.
    """
    _, _, Ci, Co = w_hwio.shape
    wi = jnp.arange(W)[None, :, None]           # (1, W, 1)
    wo = jnp.arange(W)[None, None, :]           # (1, 1, W)
    kw = jnp.arange(3)[:, None, None]           # (3, 1, 1)
    # D[kw, wi, wo] = 1  iff  wi == wo + kw - 1   (implements W zero-padding)
    D = (wi == wo + kw - 1).astype(jnp.float32)                 # (3, W, W)
    B = jnp.einsum("kxy,dkio->dxiyo", D, w_hwio.astype(jnp.float32))
    B = B.reshape(3, W * Ci, W * Co)
    eye_p = jnp.eye(p, dtype=jnp.float32)
    Bp = jnp.einsum("ab,dxy->daxby", eye_p, B)                  # (3,p,WCi,p,WCo)
    return Bp.reshape(3 * p * W * Ci, p * W * Co)


# ----------------------------------------------------------------------------
# Wrapper
# ----------------------------------------------------------------------------
def skip_feed(x_nchw, w1_hwio, b1, w2_hwio, b2, *, target_rows=512):
    """SkipFeed forward. x_nchw: (N, C, H, W) float32. Returns (N, C, H, W)."""
    x = jnp.transpose(x_nchw, (0, 2, 3, 1)).astype(jnp.float32)     # NHWC
    N, H, W, C = x.shape
    WC = W * C

    # Lane packing: p images side-by-side so the lane dim is a multiple of 128.
    p = 1
    while (p * WC) % 128 != 0 and p < 1024:
        p += 1
    L = p * WC

    # Pad batch to a whole number of lane-groups.
    Np = -(-N // p) * p
    if Np != N:
        x = jnp.concatenate([x, jnp.zeros((Np - N, H, W, C), x.dtype)], axis=0)
    G = Np // p                                    # number of lane-groups

    # Rows per grid step: NG groups with M = NG*H always a multiple of 8.
    NG0 = 8 // math.gcd(H, 8)                      # smallest NG with NG*H % 8 == 0
    NG = NG0 * max(1, -(-target_rows // (H * NG0)))
    NG = min(NG, -(-G // NG0) * NG0)
    n_blocks = -(-G // NG)
    G_pad = n_blocks * NG
    if G_pad != G:                                 # pad whole groups, never a giant block
        x = jnp.concatenate(
            [x, jnp.zeros(((G_pad - G) * p, H, W, C), x.dtype)], axis=0)
    M = NG * H

    # Layout glue: (G_pad*p, H, W, C) -> (G_pad*H, p*W*C) lane-dense rows.
    x2d = (x.reshape(G_pad, p, H, W, C)
             .transpose(0, 2, 1, 3, 4)
             .reshape(G_pad * H, L))

    W1 = _band_matrices(w1_hwio, W, p)             # (3L, L)
    W2 = _band_matrices(w2_hwio, W, p)
    b1t = jnp.tile(b1.astype(jnp.float32), p * W).reshape(1, L)
    b2t = jnp.tile(b2.astype(jnp.float32), p * W).reshape(1, L)

    kernel = _make_kernel(H, _roll_down_shift_is_positive())

    out2d = pl.pallas_call(
        kernel,
        out_shape=jax.ShapeDtypeStruct((G_pad * H, L), jnp.float32),
        grid=(n_blocks,),
        in_specs=[
            pl.BlockSpec((M, L), lambda i: (i, 0)),
            pl.BlockSpec((3 * L, L), lambda i: (0, 0)),
            pl.BlockSpec((1, L), lambda i: (0, 0)),
            pl.BlockSpec((3 * L, L), lambda i: (0, 0)),
            pl.BlockSpec((1, L), lambda i: (0, 0)),
        ],
        out_specs=pl.BlockSpec((M, L), lambda i: (i, 0)),
        compiler_params=pltpu.CompilerParams(
            dimension_semantics=("parallel",)),
    )(x2d, W1, b1t, W2, b2t)

    # Undo the lane packing / padding.
    out = (out2d.reshape(G_pad, H, p, W, C)
                 .transpose(0, 2, 1, 3, 4)
                 .reshape(G_pad * p, H, W, C)[:N])
    return jnp.transpose(out, (0, 3, 1, 2))


# ----------------------------------------------------------------------------
# Pure-JAX reference (lax conv) for correctness checking
# ----------------------------------------------------------------------------
def _reference(x_nchw, w1_hwio, b1, w2_hwio, b2):
    x = jnp.transpose(x_nchw, (0, 2, 3, 1))
    dn = jax.lax.conv_dimension_numbers(x.shape, w1_hwio.shape,
                                        ("NHWC", "HWIO", "NHWC"))
    h = jax.lax.conv_general_dilated(x, w1_hwio, (1, 1), "SAME",
                                     dimension_numbers=dn) + b1
    h = jnp.maximum(h, 0.0)
    h = jax.lax.conv_general_dilated(h, w2_hwio, (1, 1), "SAME",
                                     dimension_numbers=dn) + b2
    y = h + x
    return jnp.transpose(y, (0, 3, 1, 2))


if __name__ == "__main__":
    N, C, H, W = 2, 4, 16, 16
    key = jax.random.PRNGKey(0)
    kx, kw1, kb1, kw2, kb2 = jax.random.split(key, 5)

    x = jax.random.normal(kx, (N, C, H, W), jnp.float32)
    # Deterministic synthetic parameters (Conv2d(C, C, 3, padding=1) x 2),
    # stored HWIO = (3, 3, Cin, Cout).
    w1 = jax.random.normal(kw1, (3, 3, C, C), jnp.float32) * 0.1
    b1 = jax.random.normal(kb1, (C,), jnp.float32) * 0.1
    w2 = jax.random.normal(kw2, (3, 3, C, C), jnp.float32) * 0.1
    b2 = jax.random.normal(kb2, (C,), jnp.float32) * 0.1

    out = skip_feed(x, w1, b1, w2, b2)
    out = jax.block_until_ready(out)

    ref = _reference(x, w1, b1, w2, b2)
    assert out.shape == (N, C, H, W)
    assert jnp.allclose(out, ref, atol=1e-4, rtol=1e-4), "mismatch vs reference"

    print("KERNEL_OK")
</pallas_src>

<mosaic_0001>
module attributes {stable_mosaic.version = 11 : i64} {
  func.func @probe(%arg0: memref<8x128xf32, #tpu.memory_space<vmem>>, %arg1: memref<8x128xf32, #tpu.memory_space<vmem>>) attributes {dimension_semantics = [], scalar_prefetch = 0 : i64, scratch_operands = 0 : i64, tpu.core_type = #tpu.core_type<tc>} {
    %c0 = arith.constant 0 : index
    %c0_0 = arith.constant 0 : index
    %0 = vector.load %arg0[%c0, %c0_0] : memref<8x128xf32, #tpu.memory_space<vmem>>, vector<8x128xf32>
    %c1_i32 = arith.constant 1 : i32
    %1 = tpu.dynamic_rotate %0 by %c1_i32 dim 0 : vector<8x128xf32>, i32 -> vector<8x128xf32>
    %c0_1 = arith.constant 0 : index
    %c0_2 = arith.constant 0 : index
    %2 = vector.load %arg1[%c0_1, %c0_2] : memref<8x128xf32, #tpu.memory_space<vmem>>, vector<8x128xf32>
    tpu.vector_store %arg1[%c0_1, %c0_2], %1 {strides = array<i32>} : memref<8x128xf32, #tpu.memory_space<vmem>>, vector<8x128xf32>,
    return
  }
}

</mosaic_0001>

<bundles_post_ra>
// kernel: tpu_custom_call.1
= control target key start
LH: loop header
LB: loop body
LE: loop exit
PB: predicated region body
PF: predicated region fallthrough
CT: control target
= control target key end

     0   :  { %6 = vsyncpa [#allocation3], 0  ;;  %s125_s0 = inlined_call_operand.hbm [shape: f32[8,128], index: 0, kind: input, shape index: {}]   ;;  %s126_s1 = inlined_call_operand.hbm [shape: f32[8,128], index: 1, kind: output, shape index: {}]  }
   0x1   :  { %7 = vsyncpa [#allocation4], 0  ;;  %s89_s6 = smov [#allocation2]   ;;  %s41_s10 = scalar_lea.hbm %s125_s0, 128 }
   0x2   :  { %s14_s7 = sshll.u32 %s89_s6, 4  ;;  %p42_p0 = scmp.ne.s32.totalorder %s125_s0, %s41_s10  ;;  %s15_s7 = int_to_ptr.vmem [resolvable:$true] %s14_s7 }
   0x3   :  { %p45_p1 = scmp.lt.u32.totalorder %s41_s10, %s125_s0 }
   0x5   :  { %p47_p2 = pnand %p45_p1, %p42_p0 }
   0x7   :  { %50 = shalt.err (!%p47_p2)
}
   0x8   :  { %s51_s15 = scalar_lea.vmem %s15_s7, 128  ;;  %p56_p4 = scmp.lt.s32.totalorder %s15_s7, %s15_s7 }
   0x9   :  { %p52_p3 = scmp.ne.s32.totalorder %s15_s7, %s51_s15  ;;  %p57_p5 = scmp.lt.s32.totalorder %s51_s15, %s51_s15 }
   0xb   :  { %p58_p6 = por %p57_p5, %p56_p4 }
   0xd   :  { %p59_p7 = pnand %p58_p6, %p52_p3 }
   0xf   :  { %62 = shalt.err (!%p59_p7)
}
  0x10   :  { %17 = dma.hbm_to_vmem [thread:$0]  %s125_s0, 128, %s15_s7, [#allocation3]  }
  0x11   :  { %85 = dma.done.wait [#allocation3], 128  }
  0x12   :  { %86 = vsyncadd [#allocation3], 4294967168  ;;  %s90_s18 = smov [#allocation5]   ;;  %v21_v0 = vld [vmem:[#allocation2] sm:$0xff] }
  0x13   :  { %s30_s19 = sshll.u32 %s90_s18, 4  ;;  %v22_v1 = vrot.slane %v21_v0, 7  ;;  %s31_s19 = int_to_ptr.vmem [resolvable:$true] %s30_s19 }
  0x14   :  { %s63_s20 = scalar_lea.vmem %s31_s19, 128  ;;  %p68_p9 = scmp.lt.s32.totalorder %s31_s19, %s31_s19 }
  0x15   :  { %23 = vst [vmem:[#allocation5] sm:$0xff] %v22_v1  ;;  %p64_p8 = scmp.ne.s32.totalorder %s31_s19, %s63_s20  ;;  %p69_p10 = scmp.lt.s32.totalorder %s63_s20, %s63_s20 }
  0x17   :  { %p70_p11 = por %p69_p10, %p68_p9 }
  0x19   :  { %p71_p12 = pnand %p70_p11, %p64_p8 }
  0x1b   :  { %74 = shalt.err (!%p71_p12)
}
  0x1c   :  { %s75_s23 = scalar_lea.hbm %s126_s1, 128 }
  0x1d   :  { %p76_p13 = scmp.ne.s32.totalorder %s126_s1, %s75_s23  ;;  %p79_p0 = scmp.lt.u32.totalorder %s75_s23, %s126_s1 }
  0x1f   :  { %p81_p1 = pnand %p79_p0, %p76_p13 }
  0x21   :  { %84 = shalt.err (!%p81_p1)
}
  0x22   :  { %33 = dma.vmem_to_hbm [thread:$0]  %s31_s19, 128, %s126_s1, [#allocation4]  }
  0x23   :  { %87 = dma.done.wait [#allocation4], 128  }
  0x24   :  { %88 = vsyncadd [#allocation4], 4294967168 }
  0x25   :  { %37 = vsyncpa [#allocation3], 1 }
  0x26   :  { %38 = vsyncpa [#allocation4], 1 }

</bundles_post_ra>
